<compile_context>
chip_gen: v7x
topology: tpu7x:2x2x1
jax: 0.10.0
libtpu: 0.0.40
codegen_flags: <defaults>
</compile_context>

<pallas_src>
import jax
import jax.numpy as jnp
from jax import lax
from jax.experimental import pallas as pl
from jax.experimental.pallas import tpu as pltpu  # noqa: F401  (TPU backend)

# ---------------- model hyper-parameters (small, consistent with module) -----
S = 8          # sequence length
B = 2          # batch
E = 32         # hidden_dim
H = 4          # heads_num (E % H == 0)
DH = E // H    # head dim
F = 64         # feed-forward dim (module uses 2048; scaled down)
BS = B * S     # merged rows
LN_EPS = 1e-5
SCALE = 1.0 / (DH ** 0.5)
NEG_INF = -1e30
VEC_W = 3 * E  # width of the packed bias / layernorm slab (widest row = bqkv)

# rows of the packed vector slab
(ROW_BQKV, ROW_BO, ROW_LN1G, ROW_LN1B,
 ROW_LN2G, ROW_LN2B, ROW_B1, ROW_B2) = range(8)


def _layer_norm(x, gamma, beta):
    mean = jnp.mean(x, axis=-1, keepdims=True)
    var = jnp.mean((x - mean) ** 2, axis=-1, keepdims=True)
    inv = lax.rsqrt(var + LN_EPS)
    return (x - mean) * inv * gamma + beta


def encoder_block_kernel(x_ref, pos_ref, wqkv_ref, wo_ref, w1_ref, w2_ref,
                         vec_ref, o_ref):
    # x/pos: (BS, E) f32.  Weights: bf16.  vec: (8, VEC_W) f32 packed slab.
    x = x_ref[...]
    pos = pos_ref[...]
    vec = vec_ref[...]

    bqkv = vec[ROW_BQKV:ROW_BQKV + 1, :3 * E]
    bo   = vec[ROW_BO:ROW_BO + 1, :E]
    ln1g = vec[ROW_LN1G:ROW_LN1G + 1, :E]
    ln1b = vec[ROW_LN1B:ROW_LN1B + 1, :E]
    ln2g = vec[ROW_LN2G:ROW_LN2G + 1, :E]
    ln2b = vec[ROW_LN2B:ROW_LN2B + 1, :E]
    b1   = vec[ROW_B1:ROW_B1 + 1, :F]
    b2   = vec[ROW_B2:ROW_B2 + 1, :E]

    # --- fused Q|K|V in-projection: one (BS,2E)@(2E,3E) MXU dot ------------
    # block-diagonal weight => q = (x+pos)@(Wq*scale), k = (x+pos)@Wk, v = x@Wv
    proj_in = jnp.concatenate([x + pos, x], axis=-1).astype(jnp.bfloat16)
    qkv = jnp.dot(proj_in, wqkv_ref[...],
                  preferred_element_type=jnp.float32) + bqkv          # (BS, 3E)

    # --- in-kernel block-diagonal mask (batch = row % B for merged rows) ---
    row = lax.broadcasted_iota(jnp.int32, (BS, BS), 0)
    col = lax.broadcasted_iota(jnp.int32, (BS, BS), 1)
    mask = jnp.where((row % B) == (col % B), 0.0, NEG_INF).astype(jnp.float32)

    # --- multi-head attention (scale already folded into q) ----------------
    ctx_heads = []
    for h in range(H):                                # static unroll over heads
        lo = h * DH
        qh = qkv[:, lo:lo + DH].astype(jnp.bfloat16)
        kh = qkv[:, E + lo:E + lo + DH].astype(jnp.bfloat16)
        vh = qkv[:, 2 * E + lo:2 * E + lo + DH].astype(jnp.bfloat16)

        # contract K's last dim natively (no transpose / relayout)
        s = lax.dot_general(qh, kh,
                            dimension_numbers=(((1,), (1,)), ((), ())),
                            preferred_element_type=jnp.float32) + mask
        s = s - jnp.max(s, axis=-1, keepdims=True)
        p = jnp.exp(s)
        p = p * pl.reciprocal(jnp.sum(p, axis=-1, keepdims=True), approx=True)

        ctx_heads.append(jnp.dot(p.astype(jnp.bfloat16), vh,
                                 preferred_element_type=jnp.float32))  # (BS, DH)

    # single output-projection dot over the lane-concatenated head contexts
    ctx = jnp.concatenate(ctx_heads, axis=-1).astype(jnp.bfloat16)     # (BS, E)
    attn = jnp.dot(ctx, wo_ref[...], preferred_element_type=jnp.float32) + bo

    # --- residual + LayerNorm 1 --------------------------------------------
    x1 = _layer_norm(x + attn, ln1g, ln1b)

    # --- feed-forward --------------------------------------------------------
    h1 = jnp.dot(x1.astype(jnp.bfloat16), w1_ref[...],
                 preferred_element_type=jnp.float32) + b1
    h1 = jnp.maximum(h1, 0.0)
    ff = jnp.dot(h1.astype(jnp.bfloat16), w2_ref[...],
                 preferred_element_type=jnp.float32) + b2

    # --- residual + LayerNorm 2 ---------------------------------------------
    x2 = _layer_norm(x1 + ff, ln2g, ln2b)
    o_ref[...] = x2.astype(o_ref.dtype)


# ---------------- one-time parameter fusion (outside the hot path) ----------
def prepare_params(p):
    # Fold softmax scale into Wq / bq, build the (2E, 3E) block-diagonal
    # in-projection weight and the packed (8, VEC_W) bias/LN slab.
    wqk = jnp.concatenate([p["wq"] * SCALE, p["wk"]], axis=1)          # (E, 2E)
    top = jnp.concatenate([wqk, jnp.zeros((E, E), jnp.float32)], axis=1)
    bot = jnp.concatenate([jnp.zeros((E, 2 * E), jnp.float32), p["wv"]], axis=1)
    w_qkv = jnp.concatenate([top, bot], axis=0)                        # (2E, 3E)

    bqkv = jnp.concatenate([p["bq"] * SCALE, p["bk"], p["bv"]], axis=1)  # (1, 3E)

    def row(v):  # pad a (1, k) row vector to (1, VEC_W)
        return jnp.pad(v, ((0, 0), (0, VEC_W - v.shape[1])))

    vec = jnp.concatenate([
        row(bqkv), row(p["bo"]), row(p["ln1g"]), row(p["ln1b"]),
        row(p["ln2g"]), row(p["ln2b"]), row(p["b1"]), row(p["b2"]),
    ], axis=0)                                                         # (8, VEC_W)

    return {
        "w_qkv": w_qkv.astype(jnp.bfloat16),
        "wo": p["wo"].astype(jnp.bfloat16),
        "w1": p["w1"].astype(jnp.bfloat16),
        "w2": p["w2"].astype(jnp.bfloat16),
        "vec": vec,
    }


def encoder_block_pallas(inputs_sbe, pos_sbe, fused):
    """inputs/pos: (S, B, E) (PyTorch MultiheadAttention layout). Returns (S, B, E)."""
    x2d = inputs_sbe.reshape(BS, E)      # free reshape; row i -> batch (i % B)
    pos2d = pos_sbe.reshape(BS, E)
    out2d = pl.pallas_call(
        encoder_block_kernel,
        out_shape=jax.ShapeDtypeStruct((BS, E), jnp.float32),
    )(x2d, pos2d, fused["w_qkv"], fused["wo"], fused["w1"], fused["w2"],
      fused["vec"])
    return out2d.reshape(S, B, E)


# ---------------- pure-JAX reference (for correctness check) -----------------
def encoder_block_ref(inputs_sbe, pos_sbe, p):
    x = jnp.transpose(inputs_sbe, (1, 0, 2))     # (B, S, E)
    pos = jnp.transpose(pos_sbe, (1, 0, 2))
    qk_in = x + pos
    q = qk_in @ p["wq"] + p["bq"]
    k = qk_in @ p["wk"] + p["bk"]
    v = x @ p["wv"] + p["bv"]

    def split(t):  # (B,S,E) -> (B,H,S,DH)
        return t.reshape(B, S, H, DH).transpose(0, 2, 1, 3)

    qh, kh, vh = split(q), split(k), split(v)
    s = jnp.einsum("bhqd,bhkd->bhqk", qh, kh) * SCALE
    a = jax.nn.softmax(s, axis=-1)
    attn = jnp.einsum("bhqk,bhkd->bhqd", a, vh).transpose(0, 2, 1, 3).reshape(B, S, E)
    attn = attn @ p["wo"] + p["bo"]

    def ln(t, g, b):
        mu = jnp.mean(t, -1, keepdims=True)
        var = jnp.mean((t - mu) ** 2, -1, keepdims=True)
        return (t - mu) / jnp.sqrt(var + LN_EPS) * g + b

    x1 = ln(x + attn, p["ln1g"], p["ln1b"])
    ff = jnp.maximum(x1 @ p["w1"] + p["b1"], 0.0) @ p["w2"] + p["b2"]
    x2 = ln(x1 + ff, p["ln2g"], p["ln2b"])
    return x2.transpose(1, 0, 2)                 # (S, B, E)


def init_params(key):
    ks = jax.random.split(key, 12)

    def w(k, shape, scale=0.1):
        return jax.random.normal(k, shape, jnp.float32) * scale

    return {
        "wq": w(ks[0], (E, E)), "bq": w(ks[1], (1, E), 0.02),
        "wk": w(ks[2], (E, E)), "bk": w(ks[3], (1, E), 0.02),
        "wv": w(ks[4], (E, E)), "bv": w(ks[5], (1, E), 0.02),
        "wo": w(ks[6], (E, E)), "bo": w(ks[7], (1, E), 0.02),
        "ln1g": jnp.ones((1, E), jnp.float32), "ln1b": jnp.zeros((1, E), jnp.float32),
        "ln2g": jnp.ones((1, E), jnp.float32), "ln2b": jnp.zeros((1, E), jnp.float32),
        "w1": w(ks[8], (E, F)), "b1": w(ks[9], (1, F), 0.02),
        "w2": w(ks[10], (F, E)), "b2": w(ks[11], (1, E), 0.02),
    }


if __name__ == "__main__":
    key = jax.random.PRNGKey(0)
    k_in, k_pos, k_par = jax.random.split(key, 3)
    inputs = jax.random.normal(k_in, (S, B, E), jnp.float32)
    pos_embed = jax.random.normal(k_pos, (S, B, E), jnp.float32)
    params = init_params(k_par)

    fused = jax.tree_util.tree_map(jax.block_until_ready, prepare_params(params))

    fn = jax.jit(encoder_block_pallas)
    out = jax.block_until_ready(fn(inputs, pos_embed, fused))

    ref = encoder_block_ref(inputs, pos_embed, params)
    assert out.shape == (S, B, E)
    # tolerance absorbs bf16 MXU operands + approx EUP reciprocal in softmax
    assert jnp.allclose(out, ref, atol=5e-2, rtol=5e-2), "mismatch vs reference"
    print("KERNEL_OK")
</pallas_src>

<mosaic_0001>
module attributes {stable_mosaic.version = 11 : i64} {
  func.func @encoder_block_kernel(%arg0: memref<16x32xf32, #tpu.memory_space<vmem>>, %arg1: memref<16x32xf32, #tpu.memory_space<vmem>>, %arg2: memref<64x96xbf16, #tpu.memory_space<vmem>>, %arg3: memref<32x32xbf16, #tpu.memory_space<vmem>>, %arg4: memref<32x64xbf16, #tpu.memory_space<vmem>>, %arg5: memref<64x32xbf16, #tpu.memory_space<vmem>>, %arg6: memref<8x96xf32, #tpu.memory_space<vmem>>, %arg7: memref<16x32xf32, #tpu.memory_space<vmem>>) attributes {dimension_semantics = [], scalar_prefetch = 0 : i64, scratch_operands = 0 : i64, tpu.core_type = #tpu.core_type<tc>} {
    %c0 = arith.constant 0 : index
    %c0_0 = arith.constant 0 : index
    %0 = vector.load %arg0[%c0, %c0_0] : memref<16x32xf32, #tpu.memory_space<vmem>>, vector<16x32xf32>
    %c0_1 = arith.constant 0 : index
    %c0_2 = arith.constant 0 : index
    %1 = vector.load %arg1[%c0_1, %c0_2] : memref<16x32xf32, #tpu.memory_space<vmem>>, vector<16x32xf32>
    %c0_3 = arith.constant 0 : index
    %c0_4 = arith.constant 0 : index
    %2 = vector.load %arg6[%c0_3, %c0_4] : memref<8x96xf32, #tpu.memory_space<vmem>>, vector<8x96xf32>
    %3 = vector.extract_strided_slice %2 {offsets = [0, 0], sizes = [1, 96], strides = [1, 1]} : vector<8x96xf32> to vector<1x96xf32>
    %4 = vector.extract_strided_slice %2 {offsets = [1, 0], sizes = [1, 32], strides = [1, 1]} : vector<8x96xf32> to vector<1x32xf32>
    %5 = vector.extract_strided_slice %2 {offsets = [2, 0], sizes = [1, 32], strides = [1, 1]} : vector<8x96xf32> to vector<1x32xf32>
    %6 = vector.extract_strided_slice %2 {offsets = [3, 0], sizes = [1, 32], strides = [1, 1]} : vector<8x96xf32> to vector<1x32xf32>
    %7 = vector.extract_strided_slice %2 {offsets = [4, 0], sizes = [1, 32], strides = [1, 1]} : vector<8x96xf32> to vector<1x32xf32>
    %8 = vector.extract_strided_slice %2 {offsets = [5, 0], sizes = [1, 32], strides = [1, 1]} : vector<8x96xf32> to vector<1x32xf32>
    %9 = vector.extract_strided_slice %2 {offsets = [6, 0], sizes = [1, 64], strides = [1, 1]} : vector<8x96xf32> to vector<1x64xf32>
    %10 = vector.extract_strided_slice %2 {offsets = [7, 0], sizes = [1, 32], strides = [1, 1]} : vector<8x96xf32> to vector<1x32xf32>
    %11 = arith.addf %0, %1 : vector<16x32xf32>
    %12 = tpu.concatenate %11, %0 in 1 : vector<16x32xf32>, vector<16x32xf32> -> vector<16x64xf32>
    %13 = arith.truncf %12 : vector<16x64xf32> to vector<16x64xbf16>
    %c0_5 = arith.constant 0 : index
    %c0_6 = arith.constant 0 : index
    %14 = vector.load %arg2[%c0_5, %c0_6] : memref<64x96xbf16, #tpu.memory_space<vmem>>, vector<64x96xbf16>
    %cst = arith.constant dense<0.000000e+00> : vector<16x96xf32>
    %15 = tpu.matmul %13, %14, %cst {dimension_numbers = #tpu.dot_dimension_numbers<[1], [0], [0], [1], [0, 0, 1, 1], [], []>} : vector<16x64xbf16>, vector<64x96xbf16>, vector<16x96xf32> -> vector<16x96xf32>
    %16 = vector.broadcast %3 : vector<1x96xf32> to vector<16x96xf32>
    %17 = arith.addf %15, %16 : vector<16x96xf32>
    %18 = tpu.iota {dimensions = array<i32: 0>} : vector<16x16xi32>
    %19 = tpu.iota {dimensions = array<i32: 1>} : vector<16x16xi32>
    %c2_i32 = arith.constant 2 : i32
    %c0_i32 = arith.constant 0 : i32
    %20 = arith.cmpi eq, %c2_i32, %c0_i32 : i32
    %c1_i32 = arith.constant 1 : i32
    %21 = arith.select %20, %c1_i32, %c2_i32 : i32
    %22 = vector.broadcast %21 : i32 to vector<16x16xi32>
    %23 = arith.remsi %18, %22 : vector<16x16xi32>
    %c0_i32_7 = arith.constant 0 : i32
    %24 = vector.broadcast %c0_i32_7 : i32 to vector<16x16xi32>
    %25 = arith.cmpi ne, %23, %24 : vector<16x16xi32>
    %c0_i32_8 = arith.constant 0 : i32
    %26 = vector.broadcast %c0_i32_8 : i32 to vector<16x16xi32>
    %27 = arith.cmpi slt, %23, %26 : vector<16x16xi32>
    %c0_i32_9 = arith.constant 0 : i32
    %28 = arith.cmpi slt, %21, %c0_i32_9 : i32
    %29 = vector.broadcast %28 : i1 to vector<16x16xi1>
    %30 = vector.broadcast %29 : vector<16x16xi1> to vector<16x16xi1>
    %31 = arith.xori %27, %30 : vector<16x16xi1>
    %32 = arith.andi %31, %25 : vector<16x16xi1>
    %33 = vector.broadcast %21 : i32 to vector<16x16xi32>
    %34 = arith.addi %23, %33 : vector<16x16xi32>
    %35 = arith.select %32, %34, %23 : vector<16x16xi1>, vector<16x16xi32>
    %c2_i32_10 = arith.constant 2 : i32
    %c0_i32_11 = arith.constant 0 : i32
    %36 = arith.cmpi eq, %c2_i32_10, %c0_i32_11 : i32
    %c1_i32_12 = arith.constant 1 : i32
    %37 = arith.select %36, %c1_i32_12, %c2_i32_10 : i32
    %38 = vector.broadcast %37 : i32 to vector<16x16xi32>
    %39 = arith.remsi %19, %38 : vector<16x16xi32>
    %c0_i32_13 = arith.constant 0 : i32
    %40 = vector.broadcast %c0_i32_13 : i32 to vector<16x16xi32>
    %41 = arith.cmpi ne, %39, %40 : vector<16x16xi32>
    %c0_i32_14 = arith.constant 0 : i32
    %42 = vector.broadcast %c0_i32_14 : i32 to vector<16x16xi32>
    %43 = arith.cmpi slt, %39, %42 : vector<16x16xi32>
    %c0_i32_15 = arith.constant 0 : i32
    %44 = arith.cmpi slt, %37, %c0_i32_15 : i32
    %45 = vector.broadcast %44 : i1 to vector<16x16xi1>
    %46 = vector.broadcast %45 : vector<16x16xi1> to vector<16x16xi1>
    %47 = arith.xori %43, %46 : vector<16x16xi1>
    %48 = arith.andi %47, %41 : vector<16x16xi1>
    %49 = vector.broadcast %37 : i32 to vector<16x16xi32>
    %50 = arith.addi %39, %49 : vector<16x16xi32>
    %51 = arith.select %48, %50, %39 : vector<16x16xi1>, vector<16x16xi32>
    %52 = arith.cmpi eq, %35, %51 : vector<16x16xi32>
    %cst_16 = arith.constant 0.000000e+00 : f32
    %cst_17 = arith.constant -1.000000e+30 : f32
    %53 = vector.broadcast %cst_16 : f32 to vector<16x16xf32>
    %54 = vector.broadcast %cst_17 : f32 to vector<16x16xf32>
    %55 = arith.select %52, %53, %54 : vector<16x16xi1>, vector<16x16xf32>
    %56 = vector.extract_strided_slice %17 {offsets = [0, 0], sizes = [16, 8], strides = [1, 1]} : vector<16x96xf32> to vector<16x8xf32>
    %57 = arith.truncf %56 : vector<16x8xf32> to vector<16x8xbf16>
    %58 = vector.extract_strided_slice %17 {offsets = [0, 32], sizes = [16, 8], strides = [1, 1]} : vector<16x96xf32> to vector<16x8xf32>
    %59 = arith.truncf %58 : vector<16x8xf32> to vector<16x8xbf16>
    %60 = vector.extract_strided_slice %17 {offsets = [0, 64], sizes = [16, 8], strides = [1, 1]} : vector<16x96xf32> to vector<16x8xf32>
    %61 = arith.truncf %60 : vector<16x8xf32> to vector<16x8xbf16>
    %cst_18 = arith.constant dense<0.000000e+00> : vector<16x16xf32>
    %62 = tpu.matmul %57, %59, %cst_18 {dimension_numbers = #tpu.dot_dimension_numbers<[1], [1], [0], [0], [0, 0, 1, 0], [], []>} : vector<16x8xbf16>, vector<16x8xbf16>, vector<16x16xf32> -> vector<16x16xf32>
    %63 = arith.addf %62, %55 : vector<16x16xf32>
    %cst_19 = arith.constant dense<0xFF800000> : vector<16xf32>
    %64 = vector.multi_reduction <maximumf>, %63, %cst_19 [1] : vector<16x16xf32> to vector<16xf32>
    %65 = vector.shape_cast %64 : vector<16xf32> to vector<16x1xf32>
    %66 = vector.broadcast %65 : vector<16x1xf32> to vector<16x16xf32>
    %67 = arith.subf %63, %66 : vector<16x16xf32>
    %68 = math.exp %67 : vector<16x16xf32>
    %cst_20 = arith.constant dense<0.000000e+00> : vector<16xf32>
    %69 = vector.multi_reduction <add>, %68, %cst_20 [1] : vector<16x16xf32> to vector<16xf32>
    %70 = vector.shape_cast %69 : vector<16xf32> to vector<16x1xf32>
    %71 = tpu.reciprocal %70 {approx = true} : vector<16x1xf32> -> vector<16x1xf32>
    %72 = vector.broadcast %71 : vector<16x1xf32> to vector<16x16xf32>
    %73 = arith.mulf %68, %72 : vector<16x16xf32>
    %74 = arith.truncf %73 : vector<16x16xf32> to vector<16x16xbf16>
    %cst_21 = arith.constant dense<0.000000e+00> : vector<16x8xf32>
    %75 = tpu.matmul %74, %61, %cst_21 {dimension_numbers = #tpu.dot_dimension_numbers<[1], [0], [0], [1], [0, 0, 1, 1], [], []>} : vector<16x16xbf16>, vector<16x8xbf16>, vector<16x8xf32> -> vector<16x8xf32>
    %76 = vector.extract_strided_slice %17 {offsets = [0, 8], sizes = [16, 8], strides = [1, 1]} : vector<16x96xf32> to vector<16x8xf32>
    %77 = arith.truncf %76 : vector<16x8xf32> to vector<16x8xbf16>
    %78 = vector.extract_strided_slice %17 {offsets = [0, 40], sizes = [16, 8], strides = [1, 1]} : vector<16x96xf32> to vector<16x8xf32>
    %79 = arith.truncf %78 : vector<16x8xf32> to vector<16x8xbf16>
    %80 = vector.extract_strided_slice %17 {offsets = [0, 72], sizes = [16, 8], strides = [1, 1]} : vector<16x96xf32> to vector<16x8xf32>
    %81 = arith.truncf %80 : vector<16x8xf32> to vector<16x8xbf16>
    %cst_22 = arith.constant dense<0.000000e+00> : vector<16x16xf32>
    %82 = tpu.matmul %77, %79, %cst_22 {dimension_numbers = #tpu.dot_dimension_numbers<[1], [1], [0], [0], [0, 0, 1, 0], [], []>} : vector<16x8xbf16>, vector<16x8xbf16>, vector<16x16xf32> -> vector<16x16xf32>
    %83 = arith.addf %82, %55 : vector<16x16xf32>
    %cst_23 = arith.constant dense<0xFF800000> : vector<16xf32>
    %84 = vector.multi_reduction <maximumf>, %83, %cst_23 [1] : vector<16x16xf32> to vector<16xf32>
    %85 = vector.shape_cast %84 : vector<16xf32> to vector<16x1xf32>
    %86 = vector.broadcast %85 : vector<16x1xf32> to vector<16x16xf32>
    %87 = arith.subf %83, %86 : vector<16x16xf32>
    %88 = math.exp %87 : vector<16x16xf32>
    %cst_24 = arith.constant dense<0.000000e+00> : vector<16xf32>
    %89 = vector.multi_reduction <add>, %88, %cst_24 [1] : vector<16x16xf32> to vector<16xf32>
    %90 = vector.shape_cast %89 : vector<16xf32> to vector<16x1xf32>
    %91 = tpu.reciprocal %90 {approx = true} : vector<16x1xf32> -> vector<16x1xf32>
    %92 = vector.broadcast %91 : vector<16x1xf32> to vector<16x16xf32>
    %93 = arith.mulf %88, %92 : vector<16x16xf32>
    %94 = arith.truncf %93 : vector<16x16xf32> to vector<16x16xbf16>
    %cst_25 = arith.constant dense<0.000000e+00> : vector<16x8xf32>
    %95 = tpu.matmul %94, %81, %cst_25 {dimension_numbers = #tpu.dot_dimension_numbers<[1], [0], [0], [1], [0, 0, 1, 1], [], []>} : vector<16x16xbf16>, vector<16x8xbf16>, vector<16x8xf32> -> vector<16x8xf32>
    %96 = vector.extract_strided_slice %17 {offsets = [0, 16], sizes = [16, 8], strides = [1, 1]} : vector<16x96xf32> to vector<16x8xf32>
    %97 = arith.truncf %96 : vector<16x8xf32> to vector<16x8xbf16>
    %98 = vector.extract_strided_slice %17 {offsets = [0, 48], sizes = [16, 8], strides = [1, 1]} : vector<16x96xf32> to vector<16x8xf32>
    %99 = arith.truncf %98 : vector<16x8xf32> to vector<16x8xbf16>
    %100 = vector.extract_strided_slice %17 {offsets = [0, 80], sizes = [16, 8], strides = [1, 1]} : vector<16x96xf32> to vector<16x8xf32>
    %101 = arith.truncf %100 : vector<16x8xf32> to vector<16x8xbf16>
    %cst_26 = arith.constant dense<0.000000e+00> : vector<16x16xf32>
    %102 = tpu.matmul %97, %99, %cst_26 {dimension_numbers = #tpu.dot_dimension_numbers<[1], [1], [0], [0], [0, 0, 1, 0], [], []>} : vector<16x8xbf16>, vector<16x8xbf16>, vector<16x16xf32> -> vector<16x16xf32>
    %103 = arith.addf %102, %55 : vector<16x16xf32>
    %cst_27 = arith.constant dense<0xFF800000> : vector<16xf32>
    %104 = vector.multi_reduction <maximumf>, %103, %cst_27 [1] : vector<16x16xf32> to vector<16xf32>
    %105 = vector.shape_cast %104 : vector<16xf32> to vector<16x1xf32>
    %106 = vector.broadcast %105 : vector<16x1xf32> to vector<16x16xf32>
    %107 = arith.subf %103, %106 : vector<16x16xf32>
    %108 = math.exp %107 : vector<16x16xf32>
    %cst_28 = arith.constant dense<0.000000e+00> : vector<16xf32>
    %109 = vector.multi_reduction <add>, %108, %cst_28 [1] : vector<16x16xf32> to vector<16xf32>
    %110 = vector.shape_cast %109 : vector<16xf32> to vector<16x1xf32>
    %111 = tpu.reciprocal %110 {approx = true} : vector<16x1xf32> -> vector<16x1xf32>
    %112 = vector.broadcast %111 : vector<16x1xf32> to vector<16x16xf32>
    %113 = arith.mulf %108, %112 : vector<16x16xf32>
    %114 = arith.truncf %113 : vector<16x16xf32> to vector<16x16xbf16>
    %cst_29 = arith.constant dense<0.000000e+00> : vector<16x8xf32>
    %115 = tpu.matmul %114, %101, %cst_29 {dimension_numbers = #tpu.dot_dimension_numbers<[1], [0], [0], [1], [0, 0, 1, 1], [], []>} : vector<16x16xbf16>, vector<16x8xbf16>, vector<16x8xf32> -> vector<16x8xf32>
    %116 = vector.extract_strided_slice %17 {offsets = [0, 24], sizes = [16, 8], strides = [1, 1]} : vector<16x96xf32> to vector<16x8xf32>
    %117 = arith.truncf %116 : vector<16x8xf32> to vector<16x8xbf16>
    %118 = vector.extract_strided_slice %17 {offsets = [0, 56], sizes = [16, 8], strides = [1, 1]} : vector<16x96xf32> to vector<16x8xf32>
    %119 = arith.truncf %118 : vector<16x8xf32> to vector<16x8xbf16>
    %120 = vector.extract_strided_slice %17 {offsets = [0, 88], sizes = [16, 8], strides = [1, 1]} : vector<16x96xf32> to vector<16x8xf32>
    %121 = arith.truncf %120 : vector<16x8xf32> to vector<16x8xbf16>
    %cst_30 = arith.constant dense<0.000000e+00> : vector<16x16xf32>
    %122 = tpu.matmul %117, %119, %cst_30 {dimension_numbers = #tpu.dot_dimension_numbers<[1], [1], [0], [0], [0, 0, 1, 0], [], []>} : vector<16x8xbf16>, vector<16x8xbf16>, vector<16x16xf32> -> vector<16x16xf32>
    %123 = arith.addf %122, %55 : vector<16x16xf32>
    %cst_31 = arith.constant dense<0xFF800000> : vector<16xf32>
    %124 = vector.multi_reduction <maximumf>, %123, %cst_31 [1] : vector<16x16xf32> to vector<16xf32>
    %125 = vector.shape_cast %124 : vector<16xf32> to vector<16x1xf32>
    %126 = vector.broadcast %125 : vector<16x1xf32> to vector<16x16xf32>
    %127 = arith.subf %123, %126 : vector<16x16xf32>
    %128 = math.exp %127 : vector<16x16xf32>
    %cst_32 = arith.constant dense<0.000000e+00> : vector<16xf32>
    %129 = vector.multi_reduction <add>, %128, %cst_32 [1] : vector<16x16xf32> to vector<16xf32>
    %130 = vector.shape_cast %129 : vector<16xf32> to vector<16x1xf32>
    %131 = tpu.reciprocal %130 {approx = true} : vector<16x1xf32> -> vector<16x1xf32>
    %132 = vector.broadcast %131 : vector<16x1xf32> to vector<16x16xf32>
    %133 = arith.mulf %128, %132 : vector<16x16xf32>
    %134 = arith.truncf %133 : vector<16x16xf32> to vector<16x16xbf16>
    %cst_33 = arith.constant dense<0.000000e+00> : vector<16x8xf32>
    %135 = tpu.matmul %134, %121, %cst_33 {dimension_numbers = #tpu.dot_dimension_numbers<[1], [0], [0], [1], [0, 0, 1, 1], [], []>} : vector<16x16xbf16>, vector<16x8xbf16>, vector<16x8xf32> -> vector<16x8xf32>
    %136 = tpu.concatenate %75, %95, %115, %135 in 1 : vector<16x8xf32>, vector<16x8xf32>, vector<16x8xf32>, vector<16x8xf32> -> vector<16x32xf32>
    %137 = arith.truncf %136 : vector<16x32xf32> to vector<16x32xbf16>
    %c0_34 = arith.constant 0 : index
    %c0_35 = arith.constant 0 : index
    %138 = vector.load %arg3[%c0_34, %c0_35] : memref<32x32xbf16, #tpu.memory_space<vmem>>, vector<32x32xbf16>
    %cst_36 = arith.constant dense<0.000000e+00> : vector<16x32xf32>
    %139 = tpu.matmul %137, %138, %cst_36 {dimension_numbers = #tpu.dot_dimension_numbers<[1], [0], [0], [1], [0, 0, 1, 1], [], []>} : vector<16x32xbf16>, vector<32x32xbf16>, vector<16x32xf32> -> vector<16x32xf32>
    %140 = vector.broadcast %4 : vector<1x32xf32> to vector<16x32xf32>
    %141 = arith.addf %139, %140 : vector<16x32xf32>
    %142 = arith.addf %0, %141 : vector<16x32xf32>
    %cst_37 = arith.constant dense<0.000000e+00> : vector<16xf32>
    %143 = vector.multi_reduction <add>, %142, %cst_37 [1] : vector<16x32xf32> to vector<16xf32>
    %144 = vector.shape_cast %143 : vector<16xf32> to vector<16x1xf32>
    %cst_38 = arith.constant 3.200000e+01 : f32
    %145 = vector.broadcast %cst_38 : f32 to vector<16x1xf32>
    %146 = arith.divf %144, %145 : vector<16x1xf32>
    %147 = vector.broadcast %146 : vector<16x1xf32> to vector<16x32xf32>
    %148 = arith.subf %142, %147 : vector<16x32xf32>
    %149 = arith.mulf %148, %148 : vector<16x32xf32>
    %cst_39 = arith.constant dense<0.000000e+00> : vector<16xf32>
    %150 = vector.multi_reduction <add>, %149, %cst_39 [1] : vector<16x32xf32> to vector<16xf32>
    %151 = vector.shape_cast %150 : vector<16xf32> to vector<16x1xf32>
    %cst_40 = arith.constant 3.200000e+01 : f32
    %152 = vector.broadcast %cst_40 : f32 to vector<16x1xf32>
    %153 = arith.divf %151, %152 : vector<16x1xf32>
    %cst_41 = arith.constant 9.99999974E-6 : f32
    %154 = vector.broadcast %cst_41 : f32 to vector<16x1xf32>
    %155 = arith.addf %153, %154 : vector<16x1xf32>
    %156 = math.rsqrt %155 : vector<16x1xf32>
    %157 = vector.broadcast %146 : vector<16x1xf32> to vector<16x32xf32>
    %158 = arith.subf %142, %157 : vector<16x32xf32>
    %159 = vector.broadcast %156 : vector<16x1xf32> to vector<16x32xf32>
    %160 = arith.mulf %158, %159 : vector<16x32xf32>
    %161 = vector.broadcast %5 : vector<1x32xf32> to vector<16x32xf32>
    %162 = arith.mulf %160, %161 : vector<16x32xf32>
    %163 = vector.broadcast %6 : vector<1x32xf32> to vector<16x32xf32>
    %164 = arith.addf %162, %163 : vector<16x32xf32>
    %165 = arith.truncf %164 : vector<16x32xf32> to vector<16x32xbf16>
    %c0_42 = arith.constant 0 : index
    %c0_43 = arith.constant 0 : index
    %166 = vector.load %arg4[%c0_42, %c0_43] : memref<32x64xbf16, #tpu.memory_space<vmem>>, vector<32x64xbf16>
    %cst_44 = arith.constant dense<0.000000e+00> : vector<16x64xf32>
    %167 = tpu.matmul %165, %166, %cst_44 {dimension_numbers = #tpu.dot_dimension_numbers<[1], [0], [0], [1], [0, 0, 1, 1], [], []>} : vector<16x32xbf16>, vector<32x64xbf16>, vector<16x64xf32> -> vector<16x64xf32>
    %168 = vector.broadcast %9 : vector<1x64xf32> to vector<16x64xf32>
    %169 = arith.addf %167, %168 : vector<16x64xf32>
    %cst_45 = arith.constant 0.000000e+00 : f32
    %170 = vector.broadcast %cst_45 : f32 to vector<16x64xf32>
    %171 = arith.maximumf %169, %170 : vector<16x64xf32>
    %172 = arith.truncf %171 : vector<16x64xf32> to vector<16x64xbf16>
    %c0_46 = arith.constant 0 : index
    %c0_47 = arith.constant 0 : index
    %173 = vector.load %arg5[%c0_46, %c0_47] : memref<64x32xbf16, #tpu.memory_space<vmem>>, vector<64x32xbf16>
    %cst_48 = arith.constant dense<0.000000e+00> : vector<16x32xf32>
    %174 = tpu.matmul %172, %173, %cst_48 {dimension_numbers = #tpu.dot_dimension_numbers<[1], [0], [0], [1], [0, 0, 1, 1], [], []>} : vector<16x64xbf16>, vector<64x32xbf16>, vector<16x32xf32> -> vector<16x32xf32>
    %175 = vector.broadcast %10 : vector<1x32xf32> to vector<16x32xf32>
    %176 = arith.addf %174, %175 : vector<16x32xf32>
    %177 = arith.addf %164, %176 : vector<16x32xf32>
    %cst_49 = arith.constant dense<0.000000e+00> : vector<16xf32>
    %178 = vector.multi_reduction <add>, %177, %cst_49 [1] : vector<16x32xf32> to vector<16xf32>
    %179 = vector.shape_cast %178 : vector<16xf32> to vector<16x1xf32>
    %cst_50 = arith.constant 3.200000e+01 : f32
    %180 = vector.broadcast %cst_50 : f32 to vector<16x1xf32>
    %181 = arith.divf %179, %180 : vector<16x1xf32>
    %182 = vector.broadcast %181 : vector<16x1xf32> to vector<16x32xf32>
    %183 = arith.subf %177, %182 : vector<16x32xf32>
    %184 = arith.mulf %183, %183 : vector<16x32xf32>
    %cst_51 = arith.constant dense<0.000000e+00> : vector<16xf32>
    %185 = vector.multi_reduction <add>, %184, %cst_51 [1] : vector<16x32xf32> to vector<16xf32>
    %186 = vector.shape_cast %185 : vector<16xf32> to vector<16x1xf32>
    %cst_52 = arith.constant 3.200000e+01 : f32
    %187 = vector.broadcast %cst_52 : f32 to vector<16x1xf32>
    %188 = arith.divf %186, %187 : vector<16x1xf32>
    %cst_53 = arith.constant 9.99999974E-6 : f32
    %189 = vector.broadcast %cst_53 : f32 to vector<16x1xf32>
    %190 = arith.addf %188, %189 : vector<16x1xf32>
    %191 = math.rsqrt %190 : vector<16x1xf32>
    %192 = vector.broadcast %181 : vector<16x1xf32> to vector<16x32xf32>
    %193 = arith.subf %177, %192 : vector<16x32xf32>
    %194 = vector.broadcast %191 : vector<16x1xf32> to vector<16x32xf32>
    %195 = arith.mulf %193, %194 : vector<16x32xf32>
    %196 = vector.broadcast %7 : vector<1x32xf32> to vector<16x32xf32>
    %197 = arith.mulf %195, %196 : vector<16x32xf32>
    %198 = vector.broadcast %8 : vector<1x32xf32> to vector<16x32xf32>
    %199 = arith.addf %197, %198 : vector<16x32xf32>
    %c0_54 = arith.constant 0 : index
    %c0_55 = arith.constant 0 : index
    %200 = vector.load %arg7[%c0_54, %c0_55] : memref<16x32xf32, #tpu.memory_space<vmem>>, vector<16x32xf32>
    tpu.vector_store %arg7[%c0_54, %c0_55], %199 {strides = array<i32>} : memref<16x32xf32, #tpu.memory_space<vmem>>, vector<16x32xf32>,
    return
  }
}

</mosaic_0001>

<bundles_post_ra>
// kernel: encoder_block_pallas.1
= control target key start
LH: loop header
LB: loop body
LE: loop exit
PB: predicated region body
PF: predicated region fallthrough
CT: control target
= control target key end

     0   :  { %12 = vsyncpa [#allocation3], 0  ;;  %s1742_s0 = inlined_call_operand.vmem [shape: f32[16,32], index: 0, kind: input, shape index: {}]   ;;  %s1743_s1 = inlined_call_operand.hbm [shape: f32[16,32], index: 1, kind: input, shape index: {}]   ;;  %s1744_s2 = inlined_call_operand.vmem [shape: bf16[64,96], index: 2, kind: input, shape index: {}]   ;;  %s1745_s3 = inlined_call_operand.hbm [shape: bf16[32,32], index: 3, kind: input, shape index: {}]   ;;  %s1746_s4 = inlined_call_operand.hbm [shape: bf16[32,64], index: 4, kind: input, shape index: {}]   ;;  %s1747_s5 = inlined_call_operand.vmem [shape: bf16[64,32], index: 5, kind: input, shape index: {}]   ;;  %s1748_s6 = inlined_call_operand.hbm [shape: f32[8,96], index: 6, kind: input, shape index: {}]   ;;  %s1749_s7 = inlined_call_operand.hbm [shape: f32[16,32], index: 7, kind: output, shape index: {}]  }
   0x1   :  { %13 = vsyncpa [#allocation6], 0 }
   0x2   :  { %14 = vsyncpa [#allocation9], 0 }
   0x3   :  { %15 = vsyncpa [#allocation4], 0  ;;  %s1417_s24 = smov [#allocation5]   ;;  %s1299_s28 = scalar_lea.hbm %s1745_s3, 256 }
   0x4   :  { %s37_s25 = sshll.u32 %s1417_s24, 4  ;;  %p1300_p0 = scmp.ne.s32.totalorder %s1745_s3, %s1299_s28  ;;  %s38_s25 = int_to_ptr.vmem [resolvable:$true] %s37_s25 }
   0x5   :  { %p1303_p1 = scmp.lt.u32.totalorder %s1299_s28, %s1745_s3 }
   0x7   :  { %p1305_p2 = pnand %p1303_p1, %p1300_p0 }
   0x9   :  { %1308 = shalt.err (!%p1305_p2)
}
   0xa   :  { %s1309_s10 = scalar_lea.vmem %s38_s25, 256  ;;  %p1314_p4 = scmp.lt.s32.totalorder %s38_s25, %s38_s25 }
   0xb   :  { %p1310_p3 = scmp.ne.s32.totalorder %s38_s25, %s1309_s10  ;;  %p1315_p5 = scmp.lt.s32.totalorder %s1309_s10, %s1309_s10 }
   0xd   :  { %p1316_p6 = por %p1315_p5, %p1314_p4 }
   0xf   :  { %p1317_p7 = pnand %p1316_p6, %p1310_p3 }
  0x11   :  { %1320 = shalt.err (!%p1317_p7)
}
  0x12   :  { %s1418_s11 = smov 64   ;;  %s1419_s12 = smov 4  }
  0x13   :  { %43 = dma.hbm_to_vmem [thread:$0]  %s1745_s3, 256, %s38_s25, [#allocation6], %s1418_s11, %s1418_s11, %s1419_s12  }
  0x14   :  { %s1420_s15 = smov [#allocation2]   ;;  %s1321_s19 = scalar_lea.hbm %s1743_s1, 256 }
  0x15   :  { %s23_s16 = sshll.u32 %s1420_s15, 4  ;;  %p1322_p8 = scmp.ne.s32.totalorder %s1743_s1, %s1321_s19  ;;  %s24_s16 = int_to_ptr.vmem [resolvable:$true] %s23_s16 }
  0x16   :  { %p1325_p9 = scmp.lt.u32.totalorder %s1321_s19, %s1743_s1 }
  0x18   :  { %p1327_p10 = pnand %p1325_p9, %p1322_p8 }
  0x1a   :  { %1330 = shalt.err (!%p1327_p10)
}
  0x1b   :  { %s1331_s24 = scalar_lea.vmem %s24_s16, 256  ;;  %p1336_p12 = scmp.lt.s32.totalorder %s24_s16, %s24_s16 }
  0x1c   :  { %p1332_p11 = scmp.ne.s32.totalorder %s24_s16, %s1331_s24  ;;  %p1337_p13 = scmp.lt.s32.totalorder %s1331_s24, %s1331_s24 }
  0x1e   :  { %p1338_p0 = por %p1337_p13, %p1336_p12 }
  0x20   :  { %p1339_p1 = pnand %p1338_p0, %p1332_p11 }
  0x22   :  { %1342 = shalt.err (!%p1339_p1)
}
  0x23   :  { %s1421_s3 = smov 128   ;;  %s1422_s25 = smov 8  }
  0x24   :  { %29 = dma.hbm_to_vmem [thread:$0]  %s1743_s1, 256, %s24_s16, [#allocation3], %s1421_s3, %s1421_s3, %s1422_s25  }
  0x25   :  { %s1423_s28 = smov [#allocation7]   ;;  %s1424_s30 = smov [#allocation8]  }
  0x26   :  { %s49_s29 = sshll.u32 %s1423_s28, 4  ;;  %s64_s8 = sshll.u32 %s1424_s30, 4  ;;  %s50_s29 = int_to_ptr.vmem [resolvable:$true] %s49_s29  ;;  %s65_s8 = int_to_ptr.vmem [resolvable:$true] %s64_s8 }
  0x27   :  { %s1343_s13 = scalar_lea.hbm %s1746_s4, 256 }
  0x28   :  { %p1344_p2 = scmp.ne.s32.totalorder %s1746_s4, %s1343_s13  ;;  %p1347_p3 = scmp.lt.u32.totalorder %s1343_s13, %s1746_s4 }
  0x2a   :  { %p1349_p4 = pnand %p1347_p3, %p1344_p2 }
  0x2c   :  { %1352 = shalt.err (!%p1349_p4)
}
  0x2d   :  { %s1353_s1 = scalar_lea.vmem %s50_s29, 256  ;;  %p1358_p6 = scmp.lt.s32.totalorder %s50_s29, %s50_s29 }
  0x2e   :  { %p1354_p5 = scmp.ne.s32.totalorder %s50_s29, %s1353_s1  ;;  %p1359_p7 = scmp.lt.s32.totalorder %s1353_s1, %s1353_s1 }
  0x30   :  { %p1360_p8 = por %p1359_p7, %p1358_p6 }
  0x32   :  { %p1361_p9 = pnand %p1360_p8, %p1354_p5 }
  0x34   :  { %1364 = shalt.err (!%p1361_p9)
}
  0x35   :  { %55 = dma.hbm_to_vmem [thread:$0]  %s1746_s4, 256, %s50_s29, [#allocation6], %s1418_s11, %s1418_s11, %s1419_s12  }
  0x36   :  { %s1365_s22 = scalar_lea.hbm %s1748_s6, 128 }
  0x37   :  { %p1366_p10 = scmp.ne.s32.totalorder %s1748_s6, %s1365_s22  ;;  %p1369_p11 = scmp.lt.u32.totalorder %s1365_s22, %s1748_s6 }
  0x39   :  { %p1371_p12 = pnand %p1369_p11, %p1366_p10 }
  0x3b   :  { %1374 = shalt.err (!%p1371_p12)
}
  0x3c   :  { %s1375_s28 = scalar_lea.vmem %s65_s8, 128  ;;  %p1380_p0 = scmp.lt.s32.totalorder %s65_s8, %s65_s8 }
  0x3d   :  { %p1376_p13 = scmp.ne.s32.totalorder %s65_s8, %s1375_s28  ;;  %p1381_p1 = scmp.lt.s32.totalorder %s1375_s28, %s1375_s28 }
  0x3f   :  { %p1382_p2 = por %p1381_p1, %p1380_p0 }
  0x41   :  { %p1383_p3 = pnand %p1382_p2, %p1376_p13 }
  0x43   :  { %1386 = shalt.err (!%p1383_p3)
}
  0x44   :  { %67 = dma.hbm_to_vmem [thread:$0]  %s1748_s6, 128, %s65_s8, [#allocation9]  }
  0x45   :  { %1409 = dma.done.wait [#allocation3], 256  }
  0x46   :  { %1410 = vsyncadd [#allocation3], 4294967040 }
  0x47   :  { %1411 = dma.done.wait [#allocation6], 512  }
  0x48   :  { %1412 = vsyncadd [#allocation6], 4294966784 }
  0x49   :  { %1413 = dma.done.wait [#allocation9], 128  }
  0x4a   :  { %1414 = vsyncadd [#allocation9], 4294967168  ;;  %v1425_v0 = vmov 0.0   ;;  %vm1426_vm0 = vmmov 0   ;;  %v1548_v1 = vld [vmem:[%s1742_s0] sm:$0xff]  ;;  %v1553_v2 = vld [vmem:[%s1742_s0 + $0x8] sm:$0xff]  ;;  %v108_v18 = vlaneseq }
  0x4b   :  { %1114 = vmatprep.subr.bf16.mxu0 %v1425_v0  ;;  %1122 = vmatprep.mubr.msk.bf16.mxu0 %vm1426_vm0, %v1425_v0  ;;  %v1227_v3 = vpack.i.bf16 %v1553_v2, %v1548_v1  ;;  %v1247_v4 = vld [vmem:[%s1744_s2] sm:$0xff]   ;;  %s1427_s13 = smov 32   ;;  %v1248_v5 = vld [vmem:[%s1744_s2 + $0x8] sm:$0xff]   ;;  %v1249_v6 = vld [vmem:[%s1744_s2 + $0x10] sm:$0xff]   ;;  %vm96_vm1 = vcmask 261120   ;;  %vm136_vm2 = vcmask 523264  }
  0x4c   :  { %1126 = vmatprep.subr.bf16.mxu1 %v1425_v0  ;;  %1128 = vmatprep.mubr.msk.bf16.mxu1 %vm1426_vm0, %v1425_v0  ;;  %v1250_v7 = vld [vmem:[%s1744_s2 + $0x18] sm:$0xff]   ;;  %v83_v8 = vld [vmem:[#allocation2] sm:$0xff]  ;;  %v84_v9 = vld [vmem:[#allocation2 + $0x8] sm:$0xff]  ;;  %v1580_v19 = vshrl.u32 %v108_v18, 7  ;;  %s1428_s2 = smov 96   ;;  %vm230_vm3 = vcmask 64512  }
  0x4d   :  { %1228 = vrot.lane.b32.xlu0 %v1227_v3, %s1427_s13  ;;  %1115 = vmatpush3.bf16.msra.mxu0 %v1247_v4  ;;  %v87_v10 = vadd.f32 %v84_v9, %v1553_v2  ;;  %v86_v11 = vadd.f32 %v83_v8, %v1548_v1  ;;  %v1583_v21 = vld [vmem:[#allocation8] sm:$0xff]  ;;  %v185_v32 = vand.u32 127, %v108_v18  ;;  %v1429_v37 = vmov -1e+30   ;;  %s1430_s16 = smov 88   ;;  %s1432_s19 = smov 112  }
  0x4e   :  { %1116 = vmatprep.subr.bf16.mxu0 %v1425_v0  ;;  %v110_v20 = vsub.s32 0, %v1580_v19  ;;  %v183_v33 = vadd.s32 8, %v1580_v19  ;;  %v190_v34 = vand.u32 1, %v1580_v19  ;;  %vm278_vm6 = vcmask 130048   ;;  %s1433_s20 = smov 80   ;;  %s1434_s21 = smov 72  }
  0x4f   :  { %v214_v35 = vand.u32 1, %v185_v32  ;;  %s1435_s22 = smov 104   ;;  %s1436_s23 = smov 48   ;;  %vm740_vm7 = vcmask 195584  }
  0x50   :  { %v111_v22 = vrot.slane %v1583_v21, %v110_v20  ;;  %v197_v36 = vand.u32 1, %v183_v33  ;;  %s1437_s24 = smov 56   ;;  %s1438_s26 = smov 40  }
  0x51   :  { %1117 = vmatpush3.bf16.msra.mxu0 %v1248_v5  ;;  %vm222_vm4 = vcmp.eq.s32.totalorder %v190_v34, %v214_v35  ;;  %s1439_s27 = smov 16   ;;  %s1440_s28 = smov 24  }
  0x52   :  { %1118 = vmatprep.subr.bf16.mxu0 %v1425_v0  ;;  %vm223_vm5 = vcmp.eq.s32.totalorder %v197_v36, %v214_v35  ;;  %v1597_v38 = vsel %vm222_vm4, 0.0, %v1429_v37 }
  0x53   :  { %v1599_v40 = vsel %vm223_vm5, 0.0, %v1429_v37 }
  0x55   :  { %1119 = vmatpush3.bf16.msra.mxu0 %v1249_v6 }
  0x56   :  { %1120 = vmatprep.subr.bf16.mxu0 %v1425_v0 }
  0x59   :  { %1121 = vmatpush3.bf16.msra.mxu0 %v1250_v7 }
  0x5a   :  { %1150 = vmatprep.subr.bf16.mxu0 %v1425_v0 }
  0xbf   :  { %v1229_v12 = vpop.permute.xlu0 %1228 }
  0xc0   :  { %v1231_v13 = vunpack.i.h.bf16 %v1229_v12  ;;  %v1230_v14 = vunpack.i.l.bf16 %v1229_v12 }
  0xc2   :  { %v98_v15 = vsel %vm96_vm1, %v87_v10, %v1231_v13  ;;  %v97_v16 = vsel %vm96_vm1, %v86_v11, %v1230_v14 }
  0xc3   :  { %v99_v17 = vpack.c.bf16 %v98_v15, %v97_v16 }
  0xc5   :  { %1123 = vmatmul.mubr.msk.bf16.vlgmr.msra.gmra.mrb[0].mxu0 %vm136_vm2, %v99_v17 }
  0xc6   :  { %1152 = vmatprep.mubr.msk.bf16.mxu0 %vm1426_vm0, %v1425_v0 }
 0x198   :  { %v174_v23 = vpop.f32.mrb[0].mxu0 }
 0x199   :  { %v1124_v24 = vpop.f32.mrb[1].mxu0  ;;  %v175_v26 = vadd.f32 %v174_v23, %v111_v22 }
 0x19a   :  { %v177_v25 = vpop.f32.mrb[2].mxu0 }
 0x19b   :  { %v178_v27 = vadd.f32 %v177_v25, %v111_v22  ;;  %v1125_v28 = vpop.f32.mrb[3].mxu0 }
 0x19d   :  { %v1586_v29 = vpack.c.bf16 %v178_v27, %v175_v26 }
 0x19f   :  { %228 = vrot.lane.b32.xlu0 %v1586_v29, %s1428_s2 }
 0x211   :  { %v229_v30 = vpop.permute.xlu0 %228 }
 0x212   :  { %v235_v31 = vsel %vm230_vm3, %v229_v30, 0 }
 0x213   :  { %1127 = vmatpush3.bf16.xpose.msra.mxu1 %v235_v31 }
 0x214   :  { %1132 = vmatprep.subr.bf16.mxu1 %v1425_v0 }
 0x21a   :  { %1129 = vmatmul.mubr.msk.bf16.vlgmr.msra.gmra.mrb[0].mxu1 %vm230_vm3, %v1586_v29 }
 0x21b   :  { %1134 = vmatprep.mubr.msk.bf16.mxu1 %vm1426_vm0, %v1425_v0 }
 0x2ed   :  { %v271_v39 = vpop.f32.mrb[0].mxu1 }
 0x2ee   :  { %v272_v41 = vadd.f32 %v271_v39, %v1597_v38  ;;  %v1130_v42 = vpop.f32.mrb[1].mxu1 }
 0x2ef   :  { %v274_v43 = vpop.f32.mrb[2].mxu1 }
 0x2f0   :  { %v275_v44 = vadd.f32 %v274_v43, %v1599_v40  ;;  %v1131_v45 = vpop.f32.mrb[3].mxu1  ;;  %v279_v46 = vsel %vm278_vm6, %v272_v41, -inf }
 0x2f1   :  { %280 = vmax.xlane.f32.xlu1 %v279_v46 }
 0x2f2   :  { %v282_v47 = vsel %vm278_vm6, %v275_v44, -inf }
 0x2f5   :  { %283 = vmax.xlane.f32.xlu1 %v282_v47 }
 0x306   :  { %302 = vrot.lane.b32.xlu1 %v1586_v29, %s1418_s11  ;;  %s1431_s11 = smov 120  }
 0x30a   :  { %351 = vrot.lane.b32.xlu1 %v1586_v29, %s1430_s16 }
 0x37e   :  { %v281_v48 = vpop.xlane.xlu1 %280 }
 0x37f   :  { %v285_v49 = vsub.f32 %v272_v41, %v281_v48 }
 0x381   :  { %v287_v50 = vmul.f32 1.442695, %v285_v49 }
 0x382   :  { %v284_v51 = vpop.xlane.xlu1 %283 }
 0x383   :  { %1259 = vpow2.f32 %v287_v50  ;;  %v286_v52 = vsub.f32 %v275_v44, %v284_v51 }
 0x385   :  { %v289_v53 = vmul.f32 1.442695, %v286_v52 }
 0x386   :  { %v303_v54 = vpop.permute.xlu1 %302 }
 0x387   :  { %1261 = vpow2.f32 %v289_v53  ;;  %1133 = vmatpush3.bf16.msra.mxu1 %v303_v54 }
 0x388   :  { %1138 = vmatprep.subr.bf16.mxu1 %v1425_v0 }
 0x38a   :  { %v352_v59 = vpop.permute.xlu1 %351 }
 0x38b   :  { %v357_v10 = vsel %vm230_vm3, %v352_v59, 0 }
 0x38d   :  { %v1260_v55 = vpop.eup %1259 }
 0x38e   :  { %v291_v56 = vsel %vm278_vm6, %v1260_v55, 0.0 }
 0x38f   :  { %292 = vadd.xlane.f32.xlu0 %v291_v56 }
 0x391   :  { %v1262_v57 = vpop.eup %1261 }
 0x392   :  { %v294_v58 = vsel %vm278_vm6, %v1262_v57, 0.0 }
 0x393   :  { %295 = vadd.xlane.f32.xlu1 %v294_v58 }
 0x3a4   :  { %349 = vrot.lane.b32.xlu1 %v1586_v29, %s1431_s11 }
 0x3a5   :  { %470 = vrot.lane.b32.xlu0 %v1586_v29, %s1432_s19 }
 0x3a8   :  { %472 = vrot.lane.b32.xlu1 %v1586_v29, %s1433_s20 }
 0x3ac   :  { %593 = vrot.lane.b32.xlu1 %v1586_v29, %s1434_s21 }
 0x3b0   :  { %591 = vrot.lane.b32.xlu1 %v1586_v29, %s1435_s22 }
 0x41c   :  { %v293_v60 = vpop.xlane.xlu0 %292 }
 0x41d   :  { %1263 = vrcp.f32 %v293_v60 }
 0x420   :  { %v296_v61 = vpop.xlane.xlu1 %295  ;;  %v471_v11 = vpop.permute.xlu0 %470 }
 0x421   :  { %1265 = vrcp.f32 %v296_v61 }
 0x424   :  { %v350_v62 = vpop.permute.xlu1 %349 }
 0x427   :  { %v1264_v3 = vpop.eup %1263 }
 0x428   :  { %v473_v63 = vpop.permute.xlu1 %472  ;;  %v299_v6 = vmul.f32 %v1264_v3, %v1260_v55 }
 0x429   :  { %v478_v4 = vsel %vm230_vm3, %v473_v63, 0 }
 0x42a   :  { %1151 = vmatpush3.bf16.xpose.msra.mxu0 %v478_v4 }
 0x42b   :  { %v1266_v5 = vpop.eup %1265  ;;  %1162 = vmatprep.subr.bf16.mxu0 %v1425_v0 }
 0x42c   :  { %v300_v7 = vmul.f32 %v1266_v5, %v1262_v57  ;;  %v594_v8 = vpop.permute.xlu1 %593 }
 0x42d   :  { %v599_v12 = vsel %vm230_vm3, %v594_v8, 0 }
 0x42e   :  { %v301_v9 = vpack.c.bf16 %v300_v7, %v299_v6 }
 0x430   :  { %1135 = vmatmul.mubr.msk.bf16.vlgmr.msra.gmra.mrb[4].mxu1 %vm278_vm6, %v301_v9  ;;  %v592_v13 = vpop.permute.xlu1 %591 }
 0x431   :  { %1139 = vmatpush3.bf16.xpose.msra.mxu1 %v357_v10  ;;  %1153 = vmatmul.mubr.msk.bf16.vlgmr.msra.gmra.mrb[4].mxu0 %vm230_vm3, %v471_v11 }
 0x432   :  { %1163 = vmatpush3.bf16.xpose.msra.mxu0 %v599_v12  ;;  %1140 = vmatprep.mubr.msk.bf16.mxu1 %vm1426_vm0, %v1425_v0 }
 0x433   :  { %1164 = vmatprep.mubr.msk.bf16.mxu0 %vm1426_vm0, %v1425_v0  ;;  %1144 = vmatprep.subr.bf16.mxu1 %v1425_v0 }
 0x434   :  { %1174 = vmatprep.subr.bf16.mxu0 %v1425_v0 }
 0x438   :  { %1141 = vmatmul.mubr.msk.bf16.vlgmr.msra.gmra.mrb[8].mxu1 %vm230_vm3, %v350_v62 }
 0x439   :  { %1165 = vmatmul.mubr.msk.bf16.vlgmr.msra.gmra.mrb[8].mxu0 %vm230_vm3, %v592_v13  ;;  %1146 = vmatprep.mubr.msk.bf16.mxu1 %vm1426_vm0, %v1425_v0 }
 0x43a   :  { %1178 = vmatprep.mubr.msk.bf16.mxu0 %vm1426_vm0, %v1425_v0 }
 0x503   :  { %v1634_v14 = vpop.f32.mrb[4].mxu1 }
 0x504   :  { %v1136_v15 = vpop.f32.mrb[5].mxu1  ;;  %v514_v16 = vpop.f32.mrb[4].mxu0 }
 0x505   :  { %v1636_v17 = vpop.f32.mrb[6].mxu1  ;;  %v1154_v18 = vpop.f32.mrb[5].mxu0  ;;  %v515_v31 = vadd.f32 %v514_v16, %v1597_v38 }
 0x506   :  { %v1137_v20 = vpop.f32.mrb[7].mxu1  ;;  %v517_v22 = vpop.f32.mrb[6].mxu0 }
 0x507   :  { %v1155_v23 = vpop.f32.mrb[7].mxu0  ;;  %v518_v41 = vadd.f32 %v517_v22, %v1599_v40  ;;  %v521_v42 = vsel %vm278_vm6, %v515_v31, -inf }
 0x509   :  { %v524_v45 = vsel %vm278_vm6, %v518_v41, -inf }
 0x50b   :  { %v393_v24 = vpop.f32.mrb[8].mxu1 }
 0x50c   :  { %v394_v25 = vadd.f32 %v393_v24, %v1597_v38  ;;  %v1142_v26 = vpop.f32.mrb[9].mxu1  ;;  %v635_v27 = vpop.f32.mrb[8].mxu0 }
 0x50d   :  { %v396_v28 = vpop.f32.mrb[10].mxu1  ;;  %v1166_v30 = vpop.f32.mrb[9].mxu0  ;;  %v636_v37 = vadd.f32 %v635_v27, %v1597_v38 }
 0x50e   :  { %v397_v32 = vadd.f32 %v396_v28, %v1599_v40  ;;  %v1143_v33 = vpop.f32.mrb[11].mxu1  ;;  %v638_v34 = vpop.f32.mrb[10].mxu0  ;;  %v400_v35 = vsel %vm278_vm6, %v394_v25, -inf }
 0x50f   :  { %401 = vmax.xlane.f32.xlu1 %v400_v35  ;;  %v1167_v36 = vpop.f32.mrb[11].mxu0  ;;  %v642_v43 = vsel %vm278_vm6, %v636_v37, -inf  ;;  %v639_v44 = vadd.f32 %v638_v34, %v1599_v40 }
 0x510   :  { %v403_v39 = vsel %vm278_vm6, %v397_v32, -inf }
 0x511   :  { %404 = vmax.xlane.f32.xlu0 %v403_v39  ;;  %v645_v46 = vsel %vm278_vm6, %v639_v44, -inf }
 0x513   :  { %522 = vmax.xlane.f32.xlu1 %v521_v42 }
 0x515   :  { %643 = vmax.xlane.f32.xlu0 %v642_v43 }
 0x517   :  { %525 = vmax.xlane.f32.xlu1 %v524_v45 }
 0x51b   :  { %646 = vmax.xlane.f32.xlu1 %v645_v46 }
 0x59c   :  { %v402_v38 = vpop.xlane.xlu1 %401 }
 0x59d   :  { %v406_v51 = vsub.f32 %v394_v25, %v402_v38  ;;  %v1251_v38 = vld [vmem:[#allocation5] sm:$0xff]  }
 0x59e   :  { %v405_v47 = vpop.xlane.xlu0 %404  ;;  %1175 = vmatpush3.bf16.msra.mxu0 %v1251_v38 }
 0x59f   :  { %v408_v57 = vmul.f32 1.442695, %v406_v51  ;;  %v407_v40 = vsub.f32 %v397_v32, %v405_v47  ;;  %1176 = vmatprep.subr.bf16.mxu0 %v1425_v0  ;;  %v1252_v51 = vld [vmem:[#allocation5 + $0x8] sm:$0xff]  }
 0x5a0   :  { %v523_v48 = vpop.xlane.xlu1 %522 }
 0x5a1   :  { %v527_v49 = vsub.f32 %v515_v31, %v523_v48  ;;  %v410_v61 = vmul.f32 1.442695, %v407_v40 }
 0x5a2   :  { %v644_v50 = vpop.xlane.xlu0 %643  ;;  %1177 = vmatpush3.bf16.msra.mxu0 %v1252_v51 }
 0x5a3   :  { %v529_v52 = vmul.f32 1.442695, %v527_v49  ;;  %v648_v53 = vsub.f32 %v636_v37, %v644_v50  ;;  %1190 = vmatprep.subr.bf16.mxu0 %v1425_v0 }
 0x5a4   :  { %v526_v54 = vpop.xlane.xlu1 %525 }
 0x5a5   :  { %1267 = vpow2.f32 %v529_v52  ;;  %v650_v55 = vmul.f32 1.442695, %v648_v53  ;;  %v528_v56 = vsub.f32 %v518_v41, %v526_v54 }
 0x5a7   :  { %1269 = vpow2.f32 %v650_v55  ;;  %v531_v58 = vmul.f32 1.442695, %v528_v56 }
 0x5a8   :  { %v647_v59 = vpop.xlane.xlu1 %646 }
 0x5a9   :  { %1271 = vpow2.f32 %v531_v58  ;;  %v649_v60 = vsub.f32 %v639_v44, %v647_v59 }
 0x5aa   :  { %1273 = vpow2.f32 %v408_v57 }
 0x5ab   :  { %v652_v62 = vmul.f32 1.442695, %v649_v60 }
 0x5ad   :  { %1275 = vpow2.f32 %v652_v62 }
 0x5ae   :  { %1277 = vpow2.f32 %v410_v61 }
 0x5af   :  { %v1268_v63 = vpop.eup %1267 }
 0x5b0   :  { %v533_v3 = vsel %vm278_vm6, %v1268_v63, 0.0 }
 0x5b1   :  { %v1270_v4 = vpop.eup %1269  ;;  %534 = vadd.xlane.f32.xlu0 %v533_v3 }
 0x5b2   :  { %v654_v6 = vsel %vm278_vm6, %v1270_v4, 0.0 }
 0x5b3   :  { %v1272_v5 = vpop.eup %1271 }
 0x5b4   :  { %v536_v7 = vsel %vm278_vm6, %v1272_v5, 0.0  ;;  %v1274_v8 = vpop.eup %1273 }
 0x5b5   :  { %655 = vadd.xlane.f32.xlu0 %v654_v6  ;;  %537 = vadd.xlane.f32.xlu1 %v536_v7  ;;  %v412_v10 = vsel %vm278_vm6, %v1274_v8, 0.0 }
 0x5b7   :  { %v1276_v9 = vpop.eup %1275 }
 0x5b8   :  { %v657_v11 = vsel %vm278_vm6, %v1276_v9, 0.0  ;;  %v1278_v12 = vpop.eup %1277 }
 0x5b9   :  { %413 = vadd.xlane.f32.xlu0 %v412_v10  ;;  %658 = vadd.xlane.f32.xlu1 %v657_v11  ;;  %v415_v13 = vsel %vm278_vm6, %v1278_v12, 0.0 }
 0x5bd   :  { %416 = vadd.xlane.f32.xlu1 %v415_v13 }
 0x5ce   :  { %544 = vrot.lane.b32.xlu1 %v1586_v29, %s1436_s23 }
 0x5cf   :  { %423 = vrot.lane.b32.xlu0 %v1586_v29, %s1437_s24 }
 0x5d2   :  { %665 = vrot.lane.b32.xlu1 %v1586_v29, %s1438_s26 }
 0x63e   :  { %v535_v15 = vpop.xlane.xlu0 %534 }
 0x642   :  { %v656_v16 = vpop.xlane.xlu0 %655  ;;  %v538_v18 = vpop.xlane.xlu1 %537 }
 0x646   :  { %v414_v20 = vpop.xlane.xlu0 %413  ;;  %v659_v22 = vpop.xlane.xlu1 %658 }
 0x647   :  { %1279 = vrcp.f32 %v414_v20 }
 0x64a   :  { %v424_v23 = vpop.permute.xlu0 %423  ;;  %v417_v24 = vpop.xlane.xlu1 %416 }
 0x64b   :  { %1281 = vrcp.f32 %v417_v24  ;;  %1145 = vmatpush3.bf16.msra.mxu1 %v424_v23 }
 0x64c   :  { %1156 = vmatprep.subr.bf16.mxu1 %v1425_v0  ;;  %1283 = vrcp.f32 %v538_v18 }
 0x64d   :  { %1285 = vrcp.f32 %v535_v15  ;;  %v750_v15 = vsub.s32 1, %v1580_v19 }
 0x64e   :  { %1287 = vrcp.f32 %v659_v22  ;;  %v545_v31 = vpop.permute.xlu1 %544 }
 0x64f   :  { %1289 = vrcp.f32 %v656_v16 }
 0x651   :  { %v1280_v25 = vpop.eup %1279 }
 0x652   :  { %v420_v27 = vmul.f32 %v1280_v25, %v1274_v8  ;;  %v666_v37 = vpop.permute.xlu1 %665 }
 0x655   :  { %v1282_v26 = vpop.eup %1281 }
 0x656   :  { %v421_v28 = vmul.f32 %v1282_v26, %v1278_v12  ;;  %v1284_v30 = vpop.eup %1283 }
 0x657   :  { %v1286_v32 = vpop.eup %1285  ;;  %v542_v33 = vmul.f32 %v1284_v30, %v1272_v5 }
 0x658   :  { %v422_v29 = vpack.c.bf16 %v421_v28, %v420_v27  ;;  %v541_v34 = vmul.f32 %v1286_v32, %v1268_v63  ;;  %v1288_v36 = vpop.eup %1287 }
 0x659   :  { %v1290_v39 = vpop.eup %1289  ;;  %v663_v41 = vmul.f32 %v1288_v36, %v1276_v9 }
 0x65a   :  { %1147 = vmatmul.mubr.msk.bf16.vlgmr.msra.gmra.mrb[12].mxu1 %vm278_vm6, %v422_v29  ;;  %v543_v35 = vpack.c.bf16 %v542_v33, %v541_v34  ;;  %v662_v42 = vmul.f32 %v1290_v39, %v1270_v4  ;;  %v1255_v39 = vld [vmem:[%s1747_s5] sm:$0xff]  }
 0x65b   :  { %1157 = vmatpush3.bf16.msra.mxu1 %v545_v31  ;;  %1158 = vmatprep.mubr.msk.bf16.mxu1 %vm1426_vm0, %v1425_v0 }
 0x65c   :  { %1168 = vmatprep.subr.bf16.mxu1 %v1425_v0  ;;  %v664_v43 = vpack.c.bf16 %v663_v41, %v662_v42  ;;  %v1256_v41 = vld [vmem:[%s1747_s5 + $0x8] sm:$0xff]  }
 0x662   :  { %1159 = vmatmul.mubr.msk.bf16.vlgmr.msra.gmra.mrb[16].mxu1 %vm278_vm6, %v543_v35 }
 0x663   :  { %1169 = vmatpush3.bf16.msra.mxu1 %v666_v37  ;;  %1170 = vmatprep.mubr.msk.bf16.mxu1 %vm1426_vm0, %v1425_v0  ;;  %v1253_v37 = vld [vmem:[#allocation7] sm:$0xff]  }
 0x664   :  { %1182 = vmatprep.subr.bf16.mxu1 %v1425_v0 }
 0x66a   :  { %1171 = vmatmul.mubr.msk.bf16.vlgmr.msra.gmra.mrb[20].mxu1 %vm278_vm6, %v664_v43 }
 0x66b   :  { %1186 = vmatprep.mubr.msk.bf16.mxu1 %vm1426_vm0, %v1425_v0  ;;  %1183 = vmatpush3.bf16.msra.mxu1 %v1253_v37 }
 0x66c   :  { %1184 = vmatprep.subr.bf16.mxu1 %v1425_v0 }
 0x72d   :  { %v463_v44 = vpop.f32.mrb[12].mxu1 }
 0x72e   :  { %v1148_v45 = vpop.f32.mrb[13].mxu1 }
 0x72f   :  { %v466_v46 = vpop.f32.mrb[14].mxu1 }
 0x730   :  { %v1232_v47 = vpack.i.bf16 %v466_v46, %v463_v44  ;;  %v1149_v48 = vpop.f32.mrb[15].mxu1 }
 0x732   :  { %1233 = vrot.lane.b32.xlu0 %v1232_v47, %s1422_s25  ;;  %v839_v47 = vsub.s32 2, %v1580_v19 }
 0x734   :  { %v840_v48 = vrot.slane %v1583_v21, %v839_v47 }
 0x735   :  { %v584_v49 = vpop.f32.mrb[16].mxu1 }
 0x736   :  { %v1160_v50 = vpop.f32.mrb[17].mxu1 }
 0x737   :  { %v587_v52 = vpop.f32.mrb[18].mxu1 }
 0x738   :  { %v1237_v53 = vpack.i.bf16 %v587_v52, %v584_v49  ;;  %v1161_v54 = vpop.f32.mrb[19].mxu1  ;;  %v845_v49 = vsub.s32 3, %v1580_v19 }
 0x73a   :  { %1238 = vrot.lane.b32.xlu1 %v1237_v53, %s1439_s27 }
 0x73d   :  { %v705_v55 = vpop.f32.mrb[20].mxu1 }
 0x73e   :  { %v1172_v56 = vpop.f32.mrb[21].mxu1 }
 0x73f   :  { %v708_v57 = vpop.f32.mrb[22].mxu1 }
 0x740   :  { %v1242_v40 = vpack.i.bf16 %v708_v57, %v705_v55  ;;  %v1173_v58 = vpop.f32.mrb[23].mxu1  ;;  %v846_v55 = vrot.slane %v1583_v21, %v845_v49 }
 0x742   :  { %1243 = vrot.lane.b32.xlu0 %v1242_v40, %s1440_s28 }
 0x7a4   :  { %v1234_v59 = vpop.permute.xlu0 %1233 }
 0x7a5   :  { %v1236_v61 = vunpack.i.h.bf16 %v1234_v59  ;;  %v1235_v62 = vunpack.i.l.bf16 %v1234_v59  ;;  %v1257_v59 = vld [vmem:[%s1747_s5 + $0x10] sm:$0xff]  }
 0x7a7   :  { %v737_v5 = vsel %vm230_vm3, %v1636_v17, %v1236_v61  ;;  %v736_v6 = vsel %vm230_vm3, %v1634_v14, %v1235_v62  ;;  %v751_v17 = vrot.slane %v1583_v21, %v750_v15  ;;  %v856_v61 = vsub.s32 6, %v1580_v19 }
 0x7a9   :  { %v857_v62 = vrot.slane %v1583_v21, %v856_v61 }
 0x7ac   :  { %v1239_v60 = vpop.permute.xlu1 %1238 }
 0x7ad   :  { %v1241_v63 = vunpack.i.h.bf16 %v1239_v60  ;;  %v1240_v3 = vunpack.i.l.bf16 %v1239_v60  ;;  %v1258_v60 = vld [vmem:[%s1747_s5 + $0x18] sm:$0xff]   ;;  %s1441_s5 = smov [#allocation10]  }
 0x7ae   :  { %s1044_s13 = sshll.u32 %s1441_s5, 4  ;;  %s1045_s13 = int_to_ptr.vmem [resolvable:$true] %s1044_s13 }
 0x7af   :  { %v739_v9 = vsel %vm278_vm6, %v737_v5, %v1241_v63  ;;  %v738_v10 = vsel %vm278_vm6, %v736_v6, %v1240_v3  ;;  %s1387_s14 = scalar_lea.vmem %s1045_s13, 256  ;;  %p1392_p5 = scmp.lt.s32.totalorder %s1045_s13, %s1045_s13 }
 0x7b0   :  { %p1388_p4 = scmp.ne.s32.totalorder %s1045_s13, %s1387_s14  ;;  %p1393_p6 = scmp.lt.s32.totalorder %s1387_s14, %s1387_s14 }
 0x7b2   :  { %p1394_p7 = por %p1393_p6, %p1392_p5 }
 0x7b4   :  { %v1244_v4 = vpop.permute.xlu0 %1243  ;;  %p1395_p8 = pnand %p1394_p7, %p1388_p4 }
 0x7b5   :  { %v1246_v7 = vunpack.i.h.bf16 %v1244_v4  ;;  %v1245_v8 = vunpack.i.l.bf16 %v1244_v4 }
 0x7b7   :  { %v741_v11 = vsel %vm740_vm7, %v738_v10, %v1245_v8  ;;  %v742_v12 = vsel %vm740_vm7, %v739_v9, %v1246_v7 }
 0x7b8   :  { %v743_v13 = vpack.c.bf16 %v742_v12, %v741_v11 }
 0x7ba   :  { %1179 = vmatmul.mubr.msk.bf16.vlgmr.msra.gmra.mrb[12].mxu0 %vm96_vm1, %v743_v13 }
 0x7bb   :  { %1198 = vmatprep.mubr.msk.bf16.mxu0 %vm1426_vm0, %v1425_v0  ;;  %1191 = vmatpush3.bf16.msra.mxu0 %v1255_v39  ;;  %v1027_v39 = vsub.s32 4, %v1580_v19 }
 0x7bc   :  { %1192 = vmatprep.subr.bf16.mxu0 %v1425_v0 }
 0x7bf   :  { %1193 = vmatpush3.bf16.msra.mxu0 %v1256_v41  ;;  %v1033_v41 = vsub.s32 5, %v1580_v19 }
 0x7c0   :  { %1194 = vmatprep.subr.bf16.mxu0 %v1425_v0 }
 0x7c3   :  { %1195 = vmatpush3.bf16.msra.mxu0 %v1257_v59 }
 0x7c4   :  { %1196 = vmatprep.subr.bf16.mxu0 %v1425_v0  ;;  %v927_v0 = vsub.s32 7, %v1580_v19 }
 0x7c6   :  { %v928_v11 = vrot.slane %v1583_v21, %v927_v0 }
 0x7c7   :  { %1197 = vmatpush3.bf16.msra.mxu0 %v1258_v60 }
 0x88d   :  { %v801_v16 = vpop.f32.mrb[12].mxu0 }
 0x88e   :  { %v802_v14 = vadd.f32 %v801_v16, %v751_v17  ;;  %v1180_v18 = vpop.f32.mrb[13].mxu0 }
 0x88f   :  { %v804_v20 = vpop.f32.mrb[14].mxu0 }
 0x890   :  { %v805_v22 = vadd.f32 %v804_v20, %v751_v17  ;;  %v1181_v23 = vpop.f32.mrb[15].mxu0  ;;  %v808_v24 = vadd.f32 %v802_v14, %v1548_v1 }
 0x892   :  { %v810_v25 = vsel %vm96_vm1, %v808_v24, 0.0  ;;  %v809_v26 = vadd.f32 %v805_v22, %v1553_v2  ;;  %v1254_v2 = vld [vmem:[#allocation7 + $0x8] sm:$0xff]  }
 0x893   :  { %811 = vadd.xlane.f32.xlu1 %v810_v25  ;;  %1185 = vmatpush3.bf16.msra.mxu1 %v1254_v2 }
 0x894   :  { %v813_v27 = vsel %vm96_vm1, %v809_v26, 0.0 }
 0x895   :  { %814 = vadd.xlane.f32.xlu0 %v813_v27 }
 0x920   :  { %v812_v28 = vpop.xlane.xlu1 %811 }
 0x921   :  { %v817_v29 = vmul.f32 0.03125, %v812_v28 }
 0x922   :  { %v815_v30 = vpop.xlane.xlu0 %814 }
 0x923   :  { %v819_v31 = vsub.f32 %v808_v24, %v817_v29  ;;  %v818_v32 = vmul.f32 0.03125, %v815_v30 }
 0x925   :  { %v820_v33 = vsub.f32 %v809_v26, %v818_v32  ;;  %v821_v34 = vmul.f32 %v819_v31, %v819_v31 }
 0x927   :  { %v823_v35 = vsel %vm96_vm1, %v821_v34, 0.0  ;;  %v822_v36 = vmul.f32 %v820_v33, %v820_v33 }
 0x928   :  { %824 = vadd.xlane.f32.xlu0 %v823_v35 }
 0x929   :  { %v826_v1 = vsel %vm96_vm1, %v822_v36, 0.0 }
 0x92a   :  { %827 = vadd.xlane.f32.xlu1 %v826_v1 }
 0x9b5   :  { %v825_v42 = vpop.xlane.xlu0 %824 }
 0x9b6   :  { %v829_v43 = vmul.f32 0.03125, %v825_v42  ;;  %v1028_v42 = vrot.slane %v1583_v21, %v1027_v39 }
 0x9b7   :  { %v828_v44 = vpop.xlane.xlu1 %827 }
 0x9b8   :  { %v831_v45 = vadd.f32 1e-05, %v829_v43  ;;  %v830_v46 = vmul.f32 0.03125, %v828_v44 }
 0x9ba   :  { %1291 = vrsqrt.f32 %v831_v45  ;;  %v832_v38 = vadd.f32 1e-05, %v830_v46  ;;  %v1034_v45 = vrot.slane %v1583_v21, %v1033_v41 }
 0x9bc   :  { %1293 = vrsqrt.f32 %v832_v38 }
 0x9c4   :  { %v1292_v50 = vpop.eup %1291 }
 0x9c5   :  { %v835_v51 = vmul.f32 %v1292_v50, %v819_v31 }
 0x9c6   :  { %v1294_v52 = vpop.eup %1293 }
 0x9c7   :  { %v841_v53 = vmul.f32 %v840_v48, %v835_v51  ;;  %v836_v54 = vmul.f32 %v1294_v52, %v820_v33 }
 0x9c9   :  { %v842_v56 = vmul.f32 %v840_v48, %v836_v54  ;;  %v847_v57 = vadd.f32 %v846_v55, %v841_v53 }
 0x9cb   :  { %v848_v40 = vadd.f32 %v846_v55, %v842_v56 }
 0x9cd   :  { %v849_v58 = vpack.c.bf16 %v848_v40, %v847_v57 }
 0x9cf   :  { %1187 = vmatmul.mubr.msk.bf16.vlgmr.msra.gmra.mrb[24].mxu1 %vm96_vm1, %v849_v58 }
 0xaa2   :  { %v907_v63 = vpop.f32.mrb[24].mxu1 }
 0xaa3   :  { %v908_v3 = vadd.f32 %v907_v63, %v857_v62  ;;  %v1188_v4 = vpop.f32.mrb[25].mxu1 }
 0xaa4   :  { %v910_v5 = vpop.f32.mrb[26].mxu1 }
 0xaa5   :  { %v911_v6 = vadd.f32 %v910_v5, %v857_v62  ;;  %v1189_v7 = vpop.f32.mrb[27].mxu1  ;;  %v914_v8 = vmax.f32 %v908_v3, 0.0 }
 0xaa7   :  { %v915_v9 = vmax.f32 %v911_v6, 0.0 }
 0xaa9   :  { %v916_v10 = vpack.c.bf16 %v915_v9, %v914_v8 }
 0xaab   :  { %1199 = vmatmul.mubr.msk.bf16.vlgmr.msra.gmra.mrb[16].mxu0 %vm136_vm2, %v916_v10 }
 0xb7e   :  { %v990_v12 = vpop.f32.mrb[16].mxu0 }
 0xb7f   :  { %v991_v13 = vadd.f32 %v990_v12, %v928_v11  ;;  %v1200_v15 = vpop.f32.mrb[17].mxu0 }
 0xb80   :  { %v993_v17 = vpop.f32.mrb[18].mxu0 }
 0xb81   :  { %v994_v16 = vadd.f32 %v993_v17, %v928_v11  ;;  %v1201_v14 = vpop.f32.mrb[19].mxu0  ;;  %v997_v18 = vadd.f32 %v991_v13, %v847_v57 }
 0xb83   :  { %v999_v20 = vsel %vm96_vm1, %v997_v18, 0.0  ;;  %v998_v22 = vadd.f32 %v994_v16, %v848_v40 }
 0xb84   :  { %1000 = vadd.xlane.f32.xlu0 %v999_v20 }
 0xb85   :  { %v1002_v23 = vsel %vm96_vm1, %v998_v22, 0.0 }
 0xb86   :  { %1003 = vadd.xlane.f32.xlu1 %v1002_v23 }
 0xc11   :  { %v1001_v24 = vpop.xlane.xlu0 %1000 }
 0xc12   :  { %v1005_v25 = vmul.f32 0.03125, %v1001_v24 }
 0xc13   :  { %v1004_v26 = vpop.xlane.xlu1 %1003 }
 0xc14   :  { %v1007_v27 = vsub.f32 %v997_v18, %v1005_v25  ;;  %v1006_v28 = vmul.f32 0.03125, %v1004_v26 }
 0xc16   :  { %v1008_v29 = vsub.f32 %v998_v22, %v1006_v28  ;;  %v1009_v30 = vmul.f32 %v1007_v27, %v1007_v27 }
 0xc18   :  { %v1011_v31 = vsel %vm96_vm1, %v1009_v30, 0.0  ;;  %v1010_v32 = vmul.f32 %v1008_v29, %v1008_v29 }
 0xc19   :  { %1012 = vadd.xlane.f32.xlu0 %v1011_v31 }
 0xc1a   :  { %v1014_v33 = vsel %vm96_vm1, %v1010_v32, 0.0 }
 0xc1b   :  { %1015 = vadd.xlane.f32.xlu1 %v1014_v33 }
 0xca6   :  { %v1013_v34 = vpop.xlane.xlu0 %1012 }
 0xca7   :  { %v1017_v35 = vmul.f32 0.03125, %v1013_v34 }
 0xca8   :  { %v1016_v36 = vpop.xlane.xlu1 %1015 }
 0xca9   :  { %v1019_v1 = vadd.f32 1e-05, %v1017_v35  ;;  %v1018_v37 = vmul.f32 0.03125, %v1016_v36 }
 0xcab   :  { %1295 = vrsqrt.f32 %v1019_v1  ;;  %v1020_v2 = vadd.f32 1e-05, %v1018_v37 }
 0xcad   :  { %1297 = vrsqrt.f32 %v1020_v2 }
 0xcb5   :  { %v1296_v43 = vpop.eup %1295 }
 0xcb6   :  { %v1023_v44 = vmul.f32 %v1296_v43, %v1007_v27 }
 0xcb7   :  { %v1298_v46 = vpop.eup %1297 }
 0xcb8   :  { %v1024_v38 = vmul.f32 %v1298_v46, %v1008_v29  ;;  %v1029_v47 = vmul.f32 %v1028_v42, %v1023_v44 }
 0xcba   :  { %v1030_v48 = vmul.f32 %v1028_v42, %v1024_v38  ;;  %v1035_v49 = vadd.f32 %v1034_v45, %v1029_v47 }
 0xcbc   :  { %v1036_v50 = vadd.f32 %v1034_v45, %v1030_v48  ;;  %1037 = vst.msk [vmem:[#allocation10] sm:$0xff] %vm96_vm1, %v1035_v49 }
 0xcbe   :  { %1038 = vst.msk [vmem:[#allocation10 + $0x8] sm:$0xff] %vm96_vm1, %v1036_v50 }
 0xcbf   :  { %1398 = shalt.err (!%p1395_p8)
}
 0xcc0   :  { %s1399_s18 = scalar_lea.hbm %s1749_s7, 256 }
 0xcc1   :  { %p1400_p9 = scmp.ne.s32.totalorder %s1749_s7, %s1399_s18  ;;  %p1403_p10 = scmp.lt.u32.totalorder %s1399_s18, %s1749_s7 }
 0xcc3   :  { %p1405_p11 = pnand %p1403_p10, %p1400_p9 }
 0xcc5   :  { %1408 = shalt.err (!%p1405_p11)
}
 0xcc6   :  { %1050 = dma.vmem_to_hbm [thread:$0]  %s1045_s13, 256, %s1749_s7, [#allocation4], %s1421_s3, %s1421_s3, %s1422_s25  }
 0xcc7   :  { %1415 = dma.done.wait [#allocation4], 256  }
 0xcc8   :  { %1416 = vsyncadd [#allocation4], 4294967040 }
 0xcc9   :  { %1054 = vsyncpa [#allocation3], 1 }
 0xcca   :  { %1055 = vsyncpa [#allocation6], 1 }
 0xccb   :  { %1056 = vsyncpa [#allocation9], 1 }
 0xccc   :  { %1057 = vsyncpa [#allocation4], 1 }

</bundles_post_ra>
